<compile_context>
chip_gen: v7x
topology: tpu7x:2x2x1
jax: 0.10.0
libtpu: 0.0.40
codegen_flags: <defaults>
</compile_context>

<pallas_src>
import math

import jax
import jax.numpy as jnp
from jax.experimental import pallas as pl
from jax.experimental.pallas import tpu as pltpu


def _round_up(x, m):
    return (x + m - 1) // m * m


def _matmul_bias_kernel(lhs_ref, rhs_ref, b_ref, o_ref, acc_ref):
    """One (bm, bn) output tile: accumulate over the K grid axis in f32 scratch."""
    @pl.when(pl.program_id(2) == 0)
    def _init():
        acc_ref[...] = jnp.zeros_like(acc_ref)

    # Native (bf16) MXU operands, f32 accumulation.
    acc_ref[...] += jnp.dot(lhs_ref[...], rhs_ref[...],
                            preferred_element_type=jnp.float32)

    @pl.when(pl.program_id(2) == pl.num_programs(2) - 1)
    def _finalize():
        out = acc_ref[...] + b_ref[...].astype(jnp.float32)  # row/col broadcast
        o_ref[...] = out.astype(o_ref.dtype)


def _pallas_matmul_bias(lhs, rhs, bias2d, *, bm, bn, bk, out_dtype, true_flops):
    """out[Mp, Np] = lhs[Mp, Kp] @ rhs[Kp, Np] + bias2d (bias2d broadcasts)."""
    Mp, Kp = lhs.shape
    Kp2, Np = rhs.shape
    assert Kp == Kp2
    assert Mp % bm == 0 and Np % bn == 0 and Kp % bk == 0

    grid = (Mp // bm, Np // bn, Kp // bk)

    if bias2d.shape[0] == 1:                              # bias row (1, Np)
        b_spec = pl.BlockSpec((1, bn), lambda i, j, k: (0, j))
    else:                                                 # bias col (Mp, 1)
        b_spec = pl.BlockSpec((bm, 1), lambda i, j, k: (i, 0))

    op_b = lhs.dtype.itemsize
    out_b = jnp.dtype(out_dtype).itemsize

    # Honest cost: true flops, bytes with the re-read factors of this tiling.
    cost = pl.CostEstimate(
        flops=int(true_flops),
        transcendentals=0,
        bytes_accessed=int(Mp * Kp * op_b * (Np // bn)
                           + Kp * Np * op_b * (Mp // bm)
                           + Mp * Np * out_b),
    )

    # Double-buffered inputs + output, f32 scratch accumulator, plus margin.
    footprint = ((bm * bk + bk * bn) * 2 * op_b
                 + (bm + bn) * 2 * bias2d.dtype.itemsize
                 + bm * bn * 2 * out_b
                 + bm * bn * 4)
    vmem_limit = int(min(48 << 20, max(16 << 20, 2 * footprint)))

    return pl.pallas_call(
        _matmul_bias_kernel,
        out_shape=jax.ShapeDtypeStruct((Mp, Np), out_dtype),
        grid_spec=pltpu.PrefetchScalarGridSpec(
            num_scalar_prefetch=0,
            grid=grid,
            in_specs=[
                pl.BlockSpec((bm, bk), lambda i, j, k: (i, k)),
                pl.BlockSpec((bk, bn), lambda i, j, k: (k, j)),
                b_spec,
            ],
            out_specs=pl.BlockSpec((bm, bn), lambda i, j, k: (i, j)),
            scratch_shapes=[pltpu.VMEM((bm, bn), jnp.float32)],  # f32 accumulator
        ),
        compiler_params=pltpu.CompilerParams(
            dimension_semantics=("parallel", "parallel", "arbitrary"),
            vmem_limit_bytes=vmem_limit,
        ),
        cost_estimate=cost,
    )(lhs, rhs, bias2d)


def _pick_k_tile(K, cap=1024):
    """Contraction tile + padded K; single K step whenever round_up(K,128)<=cap."""
    k128 = _round_up(K, 128)
    if k128 <= cap:
        return k128, k128
    tk = 512
    return tk, _round_up(K, tk)


def _pick_m_tile(M, other_parallel_blocks, cap=512):
    """Row tile (multiple of 128); shrink so >=2 parallel blocks exist (2 TCs on v7x)."""
    tm = min(cap, _round_up(M, 128))
    M_pad = _round_up(M, tm)
    if other_parallel_blocks * (M_pad // tm) < 2 and tm > 128:
        tm = max(128, _round_up(tm // 2, 128))
        M_pad = _round_up(M, tm)
    return tm, M_pad


def equal_conv2d(x_nchw, weight_oihw, bias, *, stride=1, padding=0,
                 mxu_dtype=jnp.bfloat16):
    """Forward pass of EqualConv2d. x_nchw: (N, Cin, H, W) -> (N, Cout, OH, OW).

    mxu_dtype: operand dtype fed to the MXU (bf16 by default; pass jnp.float32
    for strict precision). Accumulation is always f32.
    """
    N, Cin, H, W = x_nchw.shape
    Cout, _, KH, KW = weight_oihw.shape
    scale = 1.0 / math.sqrt(Cin * KH * KW)
    out_dtype = x_nchw.dtype
    op_dtype = jnp.dtype(mxu_dtype)

    Hp, Wp = H + 2 * padding, W + 2 * padding
    OH = (Hp - KH) // stride + 1
    OW = (Wp - KW) // stride + 1
    M = N * OH * OW
    K = KH * KW * Cin

    tk, K_pad = _pick_k_tile(K)
    true_flops = 2 * M * K * Cout

    bias_vec = (bias if bias is not None
                else jnp.zeros((Cout,), jnp.float32)).astype(jnp.float32)

    x_op = x_nchw.astype(op_dtype)

    if Cout < 128:
        # ---- Transposed GEMM: out^T[Cout, M] = W^T[Cout, K] @ cols^T[K, M] ----
        # Cout only pads to the sublane granule (8); M maps to lanes (dense).
        Cout_pad = _round_up(Cout, 8)
        tc = Cout_pad
        tm, M_pad = _pick_m_tile(M, Cout_pad // tc)

        x_sp = jnp.pad(x_op, ((0, 0), (0, 0),
                              (padding, padding), (padding, padding)))
        taps = []
        for kh in range(KH):
            for kw in range(KW):
                t = x_sp[:, :,
                         kh:kh + (OH - 1) * stride + 1:stride,
                         kw:kw + (OW - 1) * stride + 1:stride]  # (N, Cin, OH, OW)
                taps.append(jnp.transpose(t, (1, 0, 2, 3)).reshape(Cin, M))
        if K_pad > K:   # fuse K zero-padding into the concat (no extra pad pass)
            taps.append(jnp.zeros((K_pad - K, M), op_dtype))
        colsT = jnp.concatenate(taps, axis=0)                   # (K_pad, M)
        if M_pad > M:
            colsT = jnp.pad(colsT, ((0, 0), (0, M_pad - M)))

        # (Cout, KH, KW, Cin) -> (Cout, K); scale folded in f32, then cast.
        wT = jnp.transpose(weight_oihw, (0, 2, 3, 1)).reshape(Cout, K)
        wT = (wT.astype(jnp.float32) * scale).astype(op_dtype)
        wT = jnp.pad(wT, ((0, Cout_pad - Cout), (0, K_pad - K)))

        b_col = jnp.pad(bias_vec, (0, Cout_pad - Cout)).reshape(Cout_pad, 1)

        outT = _pallas_matmul_bias(wT, colsT, b_col, bm=tc, bn=tm, bk=tk,
                                   out_dtype=out_dtype, true_flops=true_flops)
        out = outT[:Cout, :M].reshape(Cout, N, OH, OW)
        return jnp.transpose(out, (1, 0, 2, 3))                 # back to NCHW

    # ---- Standard GEMM: out[M, Cout] = cols[M, K] @ W[K, Cout] ---------------
    Cout_pad = _round_up(Cout, 256)        # fill the 256-wide MXU on v6e/v7x
    tn = 256
    tm, M_pad = _pick_m_tile(M, Cout_pad // tn)

    x_nhwc = jnp.transpose(x_op, (0, 2, 3, 1))
    x_sp = jnp.pad(x_nhwc, ((0, 0), (padding, padding),
                            (padding, padding), (0, 0)))
    taps = []
    for kh in range(KH):
        for kw in range(KW):
            taps.append(x_sp[:,
                             kh:kh + (OH - 1) * stride + 1:stride,
                             kw:kw + (OW - 1) * stride + 1:stride,
                             :])                                 # (N, OH, OW, Cin)
    if K_pad > K:       # fuse K zero-padding into the concat (no extra pad pass)
        taps.append(jnp.zeros((N, OH, OW, K_pad - K), op_dtype))
    cols = jnp.concatenate(taps, axis=-1).reshape(M, K_pad)
    if M_pad > M:
        cols = jnp.pad(cols, ((0, M_pad - M), (0, 0)))

    # (KH, KW, Cin, Cout) -> (K, Cout); scale folded in f32, then cast.
    w_mat = jnp.transpose(weight_oihw, (2, 3, 1, 0)).reshape(K, Cout)
    w_mat = (w_mat.astype(jnp.float32) * scale).astype(op_dtype)
    w_mat = jnp.pad(w_mat, ((0, K_pad - K), (0, Cout_pad - Cout)))

    b_row = jnp.pad(bias_vec, (0, Cout_pad - Cout)).reshape(1, Cout_pad)

    out_p = _pallas_matmul_bias(cols, w_mat, b_row, bm=tm, bn=tn, bk=tk,
                                out_dtype=out_dtype, true_flops=true_flops)
    out = out_p[:M, :Cout].reshape(N, OH, OW, Cout)
    return jnp.transpose(out, (0, 3, 1, 2))                      # back to NCHW


def _reference_conv(x_nchw, weight_oihw, bias, scale, stride, padding,
                    quantize=None):
    """Pure-JAX reference (lax conv) mirroring F.conv2d semantics.  If
    `quantize` is set (e.g. bf16), operands are rounded to that dtype first so
    the reference mirrors the kernel's MXU operand dtype."""
    xr = x_nchw.astype(jnp.float32)
    wr = weight_oihw.astype(jnp.float32) * scale
    if quantize is not None:
        xr = xr.astype(quantize).astype(jnp.float32)
        wr = wr.astype(quantize).astype(jnp.float32)
    out = jax.lax.conv_general_dilated(
        xr, wr,
        window_strides=(stride, stride),
        padding=((padding, padding), (padding, padding)),
        dimension_numbers=("NCHW", "OIHW", "NCHW"),
    )
    if bias is not None:
        out = out + bias.astype(jnp.float32)[None, :, None, None]
    return out


if __name__ == "__main__":
    key = jax.random.PRNGKey(0)
    k1, k2, k3, k4 = jax.random.split(key, 4)

    # --- Config A: EqualConv2d(4, 8, 3, stride=1, padding=1) ---------------
    # Small Cout -> transposed-GEMM (lane-dense, sublane-padded Cout) path.
    N, Cin, H, W = 2, 4, 16, 16
    Cout, ksz, stride, padding = 8, 3, 1, 1
    x = jax.random.normal(k1, (N, Cin, H, W), dtype=jnp.float32)
    w = jax.random.normal(k2, (Cout, Cin, ksz, ksz), dtype=jnp.float32)
    b = jnp.zeros((Cout,), dtype=jnp.float32)   # module __init__: bias = zeros
    scale = 1.0 / math.sqrt(Cin * ksz ** 2)

    # Default path: bf16 MXU operands, f32 accumulation.
    out = jax.block_until_ready(
        equal_conv2d(x, w, b, stride=stride, padding=padding))
    ref = jax.block_until_ready(
        _reference_conv(x, w, b, scale, stride, padding, quantize=jnp.bfloat16))
    assert out.shape == (N, Cout, H, W), out.shape
    assert jnp.allclose(out, ref, atol=1e-3, rtol=1e-3), \
        float(jnp.max(jnp.abs(out - ref)))

    # Strict-precision opt-out: f32 MXU operands end-to-end.
    out32 = jax.block_until_ready(
        equal_conv2d(x, w, b, stride=stride, padding=padding,
                     mxu_dtype=jnp.float32))
    ref32 = jax.block_until_ready(
        _reference_conv(x, w, b, scale, stride, padding, quantize=None))
    assert jnp.allclose(out32, ref32, atol=1e-4, rtol=1e-4), \
        float(jnp.max(jnp.abs(out32 - ref32)))

    # --- Config B: EqualConv2d(8, 256, 3, stride=1, padding=1) -------------
    # Large Cout -> standard-GEMM path with 256-wide output tiles.
    Cin_b, Cout_b = 8, 256
    xb = jax.random.normal(k3, (N, Cin_b, H, W), dtype=jnp.float32)
    wb = jax.random.normal(k4, (Cout_b, Cin_b, ksz, ksz), dtype=jnp.float32)
    bb = jnp.zeros((Cout_b,), dtype=jnp.float32)
    scale_b = 1.0 / math.sqrt(Cin_b * ksz ** 2)

    out_b = jax.block_until_ready(
        equal_conv2d(xb, wb, bb, stride=stride, padding=padding))
    ref_b = jax.block_until_ready(
        _reference_conv(xb, wb, bb, scale_b, stride, padding,
                        quantize=jnp.bfloat16))
    assert out_b.shape == (N, Cout_b, H, W), out_b.shape
    assert jnp.allclose(out_b, ref_b, atol=1e-3, rtol=1e-3), \
        float(jnp.max(jnp.abs(out_b - ref_b)))

    print("KERNEL_OK")
</pallas_src>

<mosaic_0001>
module attributes {stable_mosaic.version = 11 : i64} {
  func.func @_matmul_bias_kernel(%arg0: i32, %arg1: i32, %arg2: i32, %arg3: memref<8x128xbf16, #tpu.memory_space<vmem>>, %arg4: memref<128x256xbf16, #tpu.memory_space<vmem>>, %arg5: memref<8x1xf32, #tpu.memory_space<vmem>>, %arg6: memref<8x256xf32, #tpu.memory_space<vmem>>, %arg7: memref<8x256xf32, #tpu.memory_space<vmem>>) attributes {dimension_semantics = [#tpu.dimension_semantics<parallel>, #tpu.dimension_semantics<parallel>, #tpu.dimension_semantics<arbitrary>], iteration_bounds = array<i64: 1, 2, 1>, scalar_prefetch = 0 : i64, scratch_operands = 1 : i64, tpu.core_type = #tpu.core_type<tc>, window_params = [{transform_indices = @transform_0, window_bounds = array<i64: 8, 128>}, {transform_indices = @transform_1, window_bounds = array<i64: 128, 256>}, {transform_indices = @transform_2, window_bounds = array<i64: 8, 1>}, {transform_indices = @transform_3, window_bounds = array<i64: 8, 256>}]} {
    %c0_i32 = arith.constant 0 : i32
    %0 = arith.cmpi eq, %arg2, %c0_i32 : i32
    %1 = arith.extui %0 : i1 to i32
    %c0_i32_0 = arith.constant 0 : i32
    %2 = arith.cmpi ne, %1, %c0_i32_0 : i32
    scf.if %2 {
      %cst_10 = arith.constant 0.000000e+00 : f32
      %12 = vector.broadcast %cst_10 : f32 to vector<8x256xf32>
      %c0_11 = arith.constant 0 : index
      %c0_12 = arith.constant 0 : index
      %13 = vector.load %arg7[%c0_11, %c0_12] : memref<8x256xf32, #tpu.memory_space<vmem>>, vector<8x256xf32>
      tpu.vector_store %arg7[%c0_11, %c0_12], %12 {strides = array<i32>} : memref<8x256xf32, #tpu.memory_space<vmem>>, vector<8x256xf32>,
    } else {
    }
    %c0 = arith.constant 0 : index
    %c0_1 = arith.constant 0 : index
    %3 = vector.load %arg7[%c0, %c0_1] : memref<8x256xf32, #tpu.memory_space<vmem>>, vector<8x256xf32>
    %c0_2 = arith.constant 0 : index
    %c0_3 = arith.constant 0 : index
    %4 = vector.load %arg3[%c0_2, %c0_3] : memref<8x128xbf16, #tpu.memory_space<vmem>>, vector<8x128xbf16>
    %c0_4 = arith.constant 0 : index
    %c0_5 = arith.constant 0 : index
    %5 = vector.load %arg4[%c0_4, %c0_5] : memref<128x256xbf16, #tpu.memory_space<vmem>>, vector<128x256xbf16>
    %cst = arith.constant dense<0.000000e+00> : vector<8x256xf32>
    %6 = tpu.matmul %4, %5, %cst {dimension_numbers = #tpu.dot_dimension_numbers<[1], [0], [0], [1], [0, 0, 1, 1], [], []>} : vector<8x128xbf16>, vector<128x256xbf16>, vector<8x256xf32> -> vector<8x256xf32>
    %7 = arith.addf %3, %6 : vector<8x256xf32>
    %c0_6 = arith.constant 0 : index
    %c0_7 = arith.constant 0 : index
    %8 = vector.load %arg7[%c0_6, %c0_7] : memref<8x256xf32, #tpu.memory_space<vmem>>, vector<8x256xf32>
    tpu.vector_store %arg7[%c0_6, %c0_7], %7 {strides = array<i32>} : memref<8x256xf32, #tpu.memory_space<vmem>>, vector<8x256xf32>,
    %c0_i32_8 = arith.constant 0 : i32
    %9 = arith.cmpi eq, %arg2, %c0_i32_8 : i32
    %10 = arith.extui %9 : i1 to i32
    %c0_i32_9 = arith.constant 0 : i32
    %11 = arith.cmpi ne, %10, %c0_i32_9 : i32
    scf.if %11 {
      %c0_10 = arith.constant 0 : index
      %c0_11 = arith.constant 0 : index
      %12 = vector.load %arg7[%c0_10, %c0_11] : memref<8x256xf32, #tpu.memory_space<vmem>>, vector<8x256xf32>
      %c0_12 = arith.constant 0 : index
      %c0_13 = arith.constant 0 : index
      %13 = vector.load %arg5[%c0_12, %c0_13] : memref<8x1xf32, #tpu.memory_space<vmem>>, vector<8x1xf32>
      %14 = vector.broadcast %13 : vector<8x1xf32> to vector<8x256xf32>
      %15 = arith.addf %12, %14 : vector<8x256xf32>
      %c0_14 = arith.constant 0 : index
      %c0_15 = arith.constant 0 : index
      %16 = vector.load %arg6[%c0_14, %c0_15] : memref<8x256xf32, #tpu.memory_space<vmem>>, vector<8x256xf32>
      tpu.vector_store %arg6[%c0_14, %c0_15], %15 {strides = array<i32>} : memref<8x256xf32, #tpu.memory_space<vmem>>, vector<8x256xf32>,
    } else {
    }
    return
  }
  func.func @transform_0(%arg0: i32, %arg1: i32, %arg2: i32) -> (i32, i32) {
    %c0_i32 = arith.constant 0 : i32
    return %arg0, %arg2 : i32, i32
  }
  func.func @transform_1(%arg0: i32, %arg1: i32, %arg2: i32) -> (i32, i32) {
    %c0_i32 = arith.constant 0 : i32
    return %arg2, %arg1 : i32, i32
  }
  func.func @transform_2(%arg0: i32, %arg1: i32, %arg2: i32) -> (i32, i32) {
    %c0_i32 = arith.constant 0 : i32
    %c0_i32_0 = arith.constant 0 : i32
    return %arg0, %c0_i32 : i32, i32
  }
  func.func @transform_3(%arg0: i32, %arg1: i32, %arg2: i32) -> (i32, i32) {
    %c0_i32 = arith.constant 0 : i32
    return %arg0, %arg1 : i32, i32
  }
}

</mosaic_0001>

<bundles_post_ra>
// kernel: tpu_custom_call.1
= control target key start
LH: loop header
LB: loop body
LE: loop exit
PB: predicated region body
PF: predicated region fallthrough
CT: control target
= control target key end

     0   :  { %8 = vsyncpa [#allocation4], 0  ;;  %s1028_s0 = inlined_call_operand.vmem [shape: bf16[8,128], index: 0, kind: input, shape index: {}]   ;;  %s1029_s1 = inlined_call_operand.hbm [shape: bf16[128,512], index: 1, kind: input, shape index: {}]   ;;  %s1030_s2 = inlined_call_operand.vmem [shape: f32[8,1], index: 2, kind: input, shape index: {}]   ;;  %s1031_s3 = inlined_call_operand.hbm [shape: f32[8,512], index: 3, kind: output, shape index: {}]  }
   0x1   :  { %10 = vsyncpa [#allocation4 + $0x1], 0 }
   0x2   :  { %11 = vsyncpa [#allocation5], 0 }
   0x3   :  { %13 = vsyncpa [#allocation5 + $0x1], 0  ;;  %s832_s12 = smov 0   ;;  %s834_s13 = smov 0  }
   0x4   :  { %s836_s14 = smov 0   ;;  %s838_s15 = smov 0  }
   0x5   :  { %s840_s16 = smov 0   ;;  %s842_s17 = smov 0  }
   0x6 LB: > { %s566_s18 = sadd.s32 4294967295, %s804_s17   ;;  %s567_s19 = sadd.s32 4294967294, %s804_s17   ;;  %s804_s17 = sphi %s842_s17, %s19_s17   ;;  %s800_s16 = sphi %s840_s16, %s1045_s16   ;;  %s796_s15 = sphi %s838_s15, %s1044_s15   ;;  %s792_s14 = sphi %s836_s14, %s1043_s14   ;;  %s788_s13 = sphi %s834_s13, %s1042_s13   ;;  %s784_s12 = sphi %s832_s12, %s1041_s12  }
   0x7   : > { %s34_s20 = sadd.s32 1, %s800_s16  ;;  %s75_s21 = sadd.s32 1, %s792_s14 }
   0x8   : > { %p36_p0 = scmp.ge.s32.totalorder %s34_s20, 2  ;;  %p82_p1 = scmp.ne.s32.totalorder %s792_s14, %s788_s13 }
   0x9   : > { %p83_p2 = scmp.eq.s32.totalorder %s804_s17, 0  ;;  %p88_p3 = scmp.ne.s32.totalorder %s788_s13, %s784_s12 }
   0xa   : > { %s1047_s20 = smov (%p36_p0, %s34_s20), 0  ;;  %p89_p5 = scmp.eq.s32.totalorder %s566_s18, 0 }
   0xb   : > { %p873_p4 = por %p83_p2, %p82_p1  ;;  %s71_s23 = ssub.s32 %s800_s16, %s1047_s20 }
   0xc   : > { %p140_p6 = scmp.eq.s32.totalorder %s566_s18, 1  ;;  %p73_p7 = scmp.eq.s32.totalorder %s71_s23, 0 }
   0xd   : > { %p879_p8 = por %p89_p5, %p88_p3  ;;  %p146_p10 = scmp.eq.s32.totalorder %s567_s19, 1 }
   0xe   : > { %p883_p9 = por %p140_p6, %p82_p1  ;;  %p613_p13 = scmp.lt.s32.totalorder %s804_s17, 2 }
   0xf   : > { %s888_s26 = scalar_select %p73_p7, %s792_s14, %s75_s21  }
  0x10   : > { %s1035_s25 = scalar_select %p883_p9, 1, 0 }
  0x11   : > { %p890_p11 = por %p146_p10, %p88_p3  ;;  %s183_s28 = sand.u32 1, %s792_s14  }
  0x12   : > { %s572_s29 = sshll.u32 %s183_s28, 7  ;;  %s599_s30 = sshll.u32 %s800_s16, 7 }
  0x13   : > { %s1036_s27 = scalar_select %p890_p11, 1, 0 }
  0x14   : > { %s901_s6 = scalar_lea.hbm %s1029_s1, %s599_s30  ;;  %s187_s7 = scalar_lea.vmem [#allocation3], %s572_s29 }
  0x15   : > { %s197_s8 = sshll.u32 %s187_s7, 4  ;;  %p907_p0 = pnand %p613_p13, %p873_p4  ;;  %s903_s8 = int_to_ptr.vmem [resolvable:$true] %s197_s8 }
  0x16   : > { %s911_s10 = scalar_lea.sflag [#allocation4], %s183_s28  ;;  %s692_s11 = scalar_lea.hbm %s901_s6, 2048 }
  0x17   : > { %p693_p1 = scmp.ne.s32.totalorder %s901_s6, %s692_s11  ;;  %p694_p2 = pneg %p907_p0 }
  0x18   : > { %s697_s21 = scalar_lea.hbm %s1029_s1, 4096  ;;  %p698_p4 = scmp.lt.u32.totalorder %s901_s6, %s1029_s1 }
  0x19   : > { %p695_p3 = pnand %p694_p2, %p693_p1  ;;  %p699_p6 = scmp.lt.u32.totalorder %s697_s21, %s692_s11 }
  0x1a   : > { %p701_p10 = scmp.lt.u32.totalorder %s692_s11, %s901_s6 }
  0x1b   : > { %p696_p5 = pneg %p695_p3  ;;  %p700_p7 = por %p699_p6, %p698_p4 }
  0x1d   : > { %p702_p13 = por %p701_p10, %p700_p7 }
  0x1f   : > { %p703_p12 = pnand %p702_p13, %p696_p5 }
  0x21   : > { %706 = shalt.err (!%p703_p12)
}
  0x22   : > { %s707_s28 = scalar_lea.vmem %s903_s8, 2048  ;;  %s806_s29 = smov [#allocation3]  }
  0x23   : > { %p708_p1 = scmp.ne.s32.totalorder %s903_s8, %s707_s28  ;;  %s712_s30 = sshll.u32 %s806_s29, 4  ;;  %s713_s30 = int_to_ptr.vmem [resolvable:$false] %s712_s30 }
  0x24   : > { %s714_s4 = scalar_lea.vmem %s713_s30, 4096  ;;  %p715_p9 = scmp.lt.s32.totalorder %s903_s8, %s713_s30 }
  0x25   : > { %p710_p3 = pnand %p708_p1, %p694_p2  ;;  %p716_p4 = scmp.lt.s32.totalorder %s714_s4, %s707_s28 }
  0x27   : > { %p711_p11 = pneg %p710_p3  ;;  %p717_p6 = por %p716_p4, %p715_p9 }
  0x29   : > { %p718_p7 = pnand %p717_p6, %p711_p11 }
  0x2b   : > { %721 = shalt.err (!%p718_p7)
}
  0x2c   : > { %s807_s5 = smov 256   ;;  %s808_s7 = smov 128  }
  0x2d   : > { %s809_s11 = smov 8   ;;  %p575_p12 = scmp.ge.s32.totalorder %s804_s17, 1 }
  0x2e   : > { %608 = dma.hbm_to_vmem [thread:$0]  (!%p907_p0), %s901_s6, 2048, %s903_s8, %s911_s10, %s807_s5, %s808_s7, %s809_s11  }
  0x2f   : > { %p205_p2 = scmp.lt.s32.totalorder %s804_s17, 3 }
  0x31   : > { %p206_p5 = pnand %p575_p12, %p205_p2 }
  0x32   : > { %s942_s18 = sand.u32 (!%p206_p5), 1, %s788_s13  }
  0x33   : > { %209 = sbr.rel (%p206_p5) target bundleno = 322 (0x142), region = 32  ;;  %s576_s19 = sshll.u32 (!%p206_p5), %s942_s18, 7 }
  0x34   : > { %s212_s21 = scalar_lea.sflag (!%p206_p5), [#allocation4], %s942_s18  ;;  %s946_s22 = scalar_lea.vmem (!%p206_p5), [#allocation3], %s576_s19 }
  0x3a   : > { %775 = dma.done.wait (%p879_p8), %s212_s21, 2048  }
  0x3b   : > { %777 = vsyncadd (%p879_p8), %s212_s21, 4294965248  ;;  %v810_v0 = vmov 0   ;;  %v668_v1 = vld [vmem:[%s946_s22 + $0x4] ss:$8 sps:$4 sm:$0xff]   ;;  %v670_v2 = vld [vmem:[%s946_s22] ss:$8 sps:$4 sm:$0xff]  }
  0x3c   : > { %401 = vmatprep.mubr.bf16.mxu0 %v810_v0  ;;  %667 = vset.pattern.permute.xlu0 %v810_v0  ;;  %v671_v3 = vld [vmem:[%s946_s22 + $0x14] ss:$8 sps:$4 sm:$0xff]   ;;  %v673_v4 = vld [vmem:[%s946_s22 + $0x10] ss:$8 sps:$4 sm:$0xff]   ;;  %v674_v5 = vld [vmem:[%s946_s22 + $0x24] ss:$8 sps:$4 sm:$0xff]  }
  0x3d   : > { %369 = vmatprep.subr.bf16.mxu0 %v668_v1  ;;  %v676_v6 = vld [vmem:[%s946_s22 + $0x20] ss:$8 sps:$4 sm:$0xff]   ;;  %v677_v7 = vld [vmem:[%s946_s22 + $0x34] ss:$8 sps:$4 sm:$0xff]   ;;  %v679_v8 = vld [vmem:[%s946_s22 + $0x30] ss:$8 sps:$4 sm:$0xff]  }
  0x3e   : > { %370 = vmatpush1.bf16.msra.mxu0 %v670_v2  ;;  %v419_v9 = vld [vmem:[%s1030_s2] sm:$0xff]  ;;  %v683_v12 = vld [vmem:[%s946_s22 + $0x54] ss:$8 sps:$4 sm:$0xff]   ;;  %v685_v13 = vld [vmem:[%s946_s22 + $0x50] ss:$8 sps:$4 sm:$0xff]   ;;  %s577_s10 = sshll.u32 %s942_s18, 4 }
  0x3f   : > { %371 = vmatprep.subr.bf16.mxu0 %v671_v3  ;;  %v680_v10 = vld [vmem:[%s946_s22 + $0x44] ss:$8 sps:$4 sm:$0xff]   ;;  %422 = vperm.xlu0 %667, %v419_v9   ;;  %v682_v11 = vld [vmem:[%s946_s22 + $0x40] ss:$8 sps:$4 sm:$0xff]   ;;  %v689_v16 = vld [vmem:[%s946_s22 + $0x74] ss:$8 sps:$4 sm:$0xff]  }
  0x40   : > { %v686_v14 = vld [vmem:[%s946_s22 + $0x64] ss:$8 sps:$4 sm:$0xff]   ;;  %v688_v15 = vld [vmem:[%s946_s22 + $0x60] ss:$8 sps:$4 sm:$0xff]   ;;  %v691_v17 = vld [vmem:[%s946_s22 + $0x70] ss:$8 sps:$4 sm:$0xff]  }
  0x41   : > { %v272_v18 = vld [vmem:[%s1028_s0] sm:$0xf]  ;;  %s600_s23 = sshll.u32 %s796_s15, 8  ;;  %s248_s28 = scalar_lea.vmem [#allocation6], %s577_s10 }
  0x42   : > { %372 = vmatpush1.bf16.msra.mxu0 %v673_v4  ;;  %s446_s29 = sshll.u32 %s248_s28, 4  ;;  %s979_s5 = scalar_lea.hbm %s1031_s3, %s600_s23  ;;  %s981_s29 = int_to_ptr.vmem [resolvable:$true] %s446_s29 }
  0x43   : > { %373 = vmatprep.subr.bf16.mxu0 %v674_v5  ;;  %s430_s15 = scalar_lea.sflag [#allocation5], %s942_s18  ;;  %s722_s7 = scalar_lea.vmem %s981_s29, 256 }
  0x44   : > { %p723_p8 = scmp.ne.s32.totalorder %s981_s29, %s722_s7  ;;  %p1038_p9 = scmp.ne.s32.totalorder %s1035_s25, 0 }
  0x45   : > { %s811_s11 = smov [#allocation6]  }
  0x46   : > { %374 = vmatpush1.bf16.msra.mxu0 %v676_v6  ;;  %p724_p11 = pnand %p723_p8, %p1038_p9  ;;  %s726_s19 = sshll.u32 %s811_s11, 4  ;;  %s727_s19 = int_to_ptr.vmem [resolvable:$false] %s726_s19 }
  0x47   : > { %375 = vmatprep.subr.bf16.mxu0 %v677_v7  ;;  %s728_s21 = scalar_lea.vmem %s727_s19, 512  ;;  %p729_p10 = scmp.lt.s32.totalorder %s981_s29, %s727_s19 }
  0x48   : > { %p725_p0 = pneg %p724_p11  ;;  %p730_p13 = scmp.lt.s32.totalorder %s728_s21, %s722_s7 }
  0x4a   : > { %376 = vmatpush1.bf16.msra.mxu0 %v679_v8  ;;  %p731_p1 = por %p730_p13, %p729_p10 }
  0x4b   : > { %377 = vmatprep.subr.bf16.mxu0 %v680_v10 }
  0x4c   : > { %p732_p3 = pnand %p731_p1, %p725_p0 }
  0x4e   : > { %378 = vmatpush1.bf16.msra.mxu0 %v682_v11 }
  0x4f   : > { %379 = vmatprep.subr.bf16.mxu0 %v683_v12 }
  0x52   : > { %380 = vmatpush1.bf16.msra.mxu0 %v685_v13 }
  0x53   : > { %381 = vmatprep.subr.bf16.mxu0 %v686_v14 }
  0x56   : > { %382 = vmatpush1.bf16.msra.mxu0 %v688_v15 }
  0x57   : > { %383 = vmatprep.subr.bf16.mxu0 %v689_v16 }
  0x5a   : > { %384 = vmatpush1.bf16.msra.mxu0 %v691_v17 }
  0x5d   : > { %402 = vmatmul.mubr.bf16.vlgmr.msra.gmra.mrb[0].mxu0 %v272_v18 }
  0xbe   : > { %v423_v19 = vpop.permute.xlu0 %422 }
 0x130   : > { %v403_v20 = vpop.f32.mrb[0].mxu0 }
 0x131   : > { %v425_v21 = vadd.f32 %v423_v19, %v403_v20  ;;  %v405_v22 = vpop.f32.mrb[1].mxu0 }
 0x132   : > { %v426_v23 = vadd.f32 %v423_v19, %v405_v22  ;;  %v407_v24 = vpop.f32.mrb[2].mxu0 }
 0x133   : > { %427 = vst [vmem:[%s248_s28] sm:$0xff] %v425_v21  ;;  %v408_v25 = vpop.f32.mrb[3].mxu0 }
 0x134   : > { %428 = vst [vmem:[%s248_s28 + $0x8] sm:$0xff] %v426_v23 }
 0x135   : > { %735 = shalt.err (!%p732_p3)
}
 0x136   : > { %s736_s18 = scalar_lea.hbm %s979_s5, 256  ;;  %s740_s6 = scalar_lea.hbm %s1031_s3, 512 }
 0x137   : > { %p737_p4 = scmp.ne.s32.totalorder %s979_s5, %s736_s18  ;;  %p741_p12 = scmp.lt.u32.totalorder %s979_s5, %s1031_s3 }
 0x138   : > { %p742_p2 = scmp.lt.u32.totalorder %s740_s6, %s736_s18  ;;  %p744_p8 = scmp.lt.u32.totalorder %s736_s18, %s979_s5 }
 0x139   : > { %p738_p6 = pnand %p737_p4, %p1038_p9 }
 0x13a   : > { %p743_p5 = por %p742_p2, %p741_p12 }
 0x13b   : > { %p739_p7 = pneg %p738_p6 }
 0x13c   : > { %p745_p11 = por %p744_p8, %p743_p5 }
 0x13e   : > { %p746_p0 = pnand %p745_p11, %p739_p7 }
 0x140   : > { %749 = shalt.err (!%p746_p0)
}
 0x141   : > { %603 = dma.vmem_to_hbm [thread:$0]  (%p1038_p9), %s981_s29, 256, %s979_s5, %s430_s15  }
 0x142 PF: > { %s458_s10 = sand.u32 1, %s784_s12   ;;  %p1039_p10 = scmp.ne.s32.totalorder %s1036_s27, 0 }
 0x143   : > { %p1040_p13 = scmp.ge.s32.totalorder %s804_s17, 2  ;;  %s459_s23 = scalar_lea.sflag [#allocation5], %s458_s10 }
 0x145   : > { %p610_p1 = pnand %p1040_p13, %p1039_p10 }
 0x147   : > { %779 = dma.done.wait (!%p610_p1), %s459_s23, 256  }
 0x148   : > { %781 = vsyncadd (!%p610_p1), %s459_s23, 4294967040  ;;  %s19_s17 = sadd.s32 1, %s804_s17   ;;  %s1041_s12 = smov %s788_s13 }
 0x149   : > { %p16_p3 = scmp.ge.s32.totalorder %s19_s17, 4   ;;  %s1042_s13 = smov %s792_s14 }
 0x14a   : > { %s1043_s14 = smov %s888_s26  ;;  %s1044_s15 = smov %s800_s16 }
 0x14b   : > { %s1045_s16 = smov %s1047_s20  ;;  %18 = sbr.rel (!%p16_p3) target bundleno = 6 (0x6), region = 91 }
 0x152   :  { %464 = vsyncpa [#allocation4], 1 }
 0x153   :  { %466 = vsyncpa [#allocation4 + $0x1], 1 }
 0x154   :  { %467 = vsyncpa [#allocation5], 1 }
 0x155   :  { %469 = vsyncpa [#allocation5 + $0x1], 1 }

</bundles_post_ra>
